<compile_context>
chip_gen: v6e
topology: v6e:2x2x1
jax: 0.10.0
libtpu: 0.0.40
codegen_flags: <defaults>
</compile_context>

<pallas_src>
import jax
import jax.numpy as jnp
from jax import lax
from jax.experimental import pallas as pl
from jax.experimental.pallas import tpu as pltpu


def _round_up(x, m):
    return ((x + m - 1) // m) * m


def _choose_tile_n(n, sublane_mult):
    """Largest batch tile whose padding waste is <= 1/8, else minimal padding."""
    candidates = [c for c in (512, 256, 128, 64, 32, 16, 8) if c % sublane_mult == 0]
    best = None
    for c in candidates:
        n_pad = _round_up(max(n, sublane_mult), c)
        if (n_pad - n) / n_pad <= 0.125:
            return c, n_pad
        if best is None or n_pad < best[1]:
            best = (c, n_pad)
    return best


# ---------------------------------------------------------------------------
# Kernels
# ---------------------------------------------------------------------------
def _head_resident_kernel(x_ref, w_ref, b_ref, o_ref):
    """Weight-resident path: one MXU dot + bias per batch tile.

    x_ref: (TILE_N, D)      activations for one batch tile
    w_ref: (L_SUB, D)       normalization-folded weight, resident in VMEM
    b_ref: (1, L_SUB)       folded bias (f32)
    o_ref: (TILE_N, L_SUB)  logits
    """
    acc = lax.dot_general(
        x_ref[...], w_ref[...],
        dimension_numbers=(((1,), (1,)), ((), ())),   # x @ W^T on the MXU
        preferred_element_type=jnp.float32,
    )
    o_ref[...] = (acc + b_ref[...]).astype(o_ref.dtype)


def _head_ktiled_kernel(x_ref, w_ref, b_ref, o_ref, acc_ref):
    """K-tiled fallback for very large D (weight does not fit VMEM)."""
    k = pl.program_id(1)

    @pl.when(k == 0)
    def _():
        acc_ref[...] = jnp.zeros_like(acc_ref)

    acc_ref[...] += lax.dot_general(
        x_ref[...], w_ref[...],
        dimension_numbers=(((1,), (1,)), ((), ())),
        preferred_element_type=jnp.float32,
    )

    @pl.when(k == pl.num_programs(1) - 1)
    def _():
        o_ref[...] = (acc_ref[...] + b_ref[...]).astype(o_ref.dtype)


# ---------------------------------------------------------------------------
# Wrapper: fold once at init, one pallas_call per forward
# ---------------------------------------------------------------------------
class PallasClassifierHead:
    """NormalizeLayer(per-channel mu/sigma) -> Flatten -> Linear logits."""

    _RESIDENT_VMEM_BUDGET = 24 << 20   # conservative for v7x (64 MiB physical)

    def __init__(self, feature_shape, mu, sigma, weight, bias,
                 precision="float", *, max_resident_bytes=None, force_tile_k=None):
        feature_shape = tuple(int(s) for s in feature_shape)
        D = 1
        for s in feature_shape:
            D *= s
        L = int(weight.shape[0])
        assert weight.shape == (L, D), (weight.shape, (L, D))

        # ---- Fold normalization into the linear layer, in f32, ONCE ----
        bshape = (feature_shape[0],) + (1,) * (len(feature_shape) - 1)
        mu_full = jnp.broadcast_to(
            jnp.asarray(mu, jnp.float32).reshape(bshape), feature_shape).reshape(D)
        inv_sigma_full = 1.0 / jnp.broadcast_to(
            jnp.asarray(sigma, jnp.float32).reshape(bshape), feature_shape).reshape(D)
        w_eff = jnp.asarray(weight, jnp.float32) * inv_sigma_full[None, :]   # (L, D)
        b_eff = jnp.asarray(bias, jnp.float32) - w_eff @ mu_full             # (L,)

        if precision == "half":
            compute_dtype = jnp.bfloat16
        else:
            compute_dtype = jnp.float32
            # TODO(synk): precision='double' has no f64 MXU path on TPU; mapped to f32.

        self._compute_dtype = compute_dtype
        self._out_dtype = compute_dtype
        self._sublane = 16 if compute_dtype == jnp.bfloat16 else 8
        self._D = D
        self._L = L
        # Label axis padded only to a sublane multiple (NOT 128).
        self._L_SUB = _round_up(max(L, self._sublane), self._sublane)

        w_p = w_eff
        if self._L_SUB != L:
            w_p = jnp.zeros((self._L_SUB, D), jnp.float32).at[:L].set(w_eff)
        b_p = jnp.zeros((1, self._L_SUB), jnp.float32).at[0, :L].set(b_eff)

        self._w = jax.device_put(w_p.astype(compute_dtype))   # cached, padded weight
        self._b = jax.device_put(b_p)                          # bias stays f32

        self._max_resident_bytes = (self._RESIDENT_VMEM_BUDGET
                                    if max_resident_bytes is None else int(max_resident_bytes))
        if force_tile_k is not None:
            assert force_tile_k % 128 == 0
        self._force_tile_k = force_tile_k
        self._forward = jax.jit(self._forward_impl)

    def __call__(self, x):
        return self._forward(x, self._w, self._b)

    # ---- traced forward (all tiling decisions use static shapes) ----
    def _forward_impl(self, x, w, b):
        N = x.shape[0]
        D, L, L_SUB = self._D, self._L, self._L_SUB
        dt = self._compute_dtype
        isz = jnp.dtype(dt).itemsize
        out_isz = jnp.dtype(self._out_dtype).itemsize

        x_flat = x.reshape(N, D).astype(dt)

        tile_n, n_pad = _choose_tile_n(N, self._sublane)
        # v7x has 2 TensorCores: give the "parallel" batch axis >= 2 tiles when
        # there is enough real work to split (no-op on single-TC v5e/v6e).
        if n_pad // tile_n == 1 and tile_n // 2 >= self._sublane and N > tile_n // 2:
            tile_n //= 2
        n_tiles = n_pad // tile_n

        if n_pad != N:   # only pad x when shapes actually misalign
            x_flat = jnp.zeros((n_pad, D), dt).at[:N].set(x_flat)

        # Conservative VMEM estimate for the weight-resident path (2x buffers).
        resident_bytes = (2 * tile_n * D * isz          # x (double-buffered)
                          + 2 * L_SUB * D * isz         # resident weight
                          + 2 * L_SUB * 4               # bias
                          + 2 * tile_n * L_SUB * 4)     # output
        use_resident = (self._force_tile_k is None
                        and resident_bytes <= self._max_resident_bytes)

        if use_resident:
            vmem_limit = int(min(max(resident_bytes + (8 << 20), 32 << 20), 56 << 20))
            out = pl.pallas_call(
                _head_resident_kernel,
                out_shape=jax.ShapeDtypeStruct((n_pad, L_SUB), self._out_dtype),
                grid=(n_tiles,),
                in_specs=[
                    pl.BlockSpec((tile_n, D), lambda i: (i, 0)),   # x tile
                    pl.BlockSpec((L_SUB, D), lambda i: (0, 0)),    # W: DMA'd once, resident
                    pl.BlockSpec((1, L_SUB), lambda i: (0, 0)),    # bias
                ],
                out_specs=pl.BlockSpec((tile_n, L_SUB), lambda i: (i, 0)),
                compiler_params=pltpu.CompilerParams(
                    dimension_semantics=("parallel",),
                    vmem_limit_bytes=vmem_limit,
                ),
                cost_estimate=pl.CostEstimate(
                    flops=2 * n_pad * D * L_SUB,
                    transcendentals=0,
                    bytes_accessed=(n_pad * D * isz + L_SUB * D * isz
                                    + L_SUB * 4 + n_pad * L_SUB * out_isz),
                ),
            )(x_flat, w, b)
        else:
            # ---- K-tiled fallback (very large D): big TILE_K, f32 accumulator ----
            tile_k = self._force_tile_k
            if tile_k is None:
                for cand in (2048, 1536, 1024, 512, 384, 256, 128):
                    if D % cand == 0:
                        tile_k = cand
                        break
                else:
                    tile_k = 2048
            d_pad = _round_up(D, tile_k)
            if d_pad != D:
                # TODO(synk): rare path -- pads x/W along D with zeros per call.
                x_flat = jnp.zeros((n_pad, d_pad), dt).at[:, :D].set(x_flat)
                w = jnp.zeros((L_SUB, d_pad), dt).at[:, :D].set(w)
            k_tiles = d_pad // tile_k

            out = pl.pallas_call(
                _head_ktiled_kernel,
                out_shape=jax.ShapeDtypeStruct((n_pad, L_SUB), self._out_dtype),
                grid=(n_tiles, k_tiles),
                in_specs=[
                    pl.BlockSpec((tile_n, tile_k), lambda i, k: (i, k)),   # x
                    pl.BlockSpec((L_SUB, tile_k), lambda i, k: (0, k)),    # W strip
                    pl.BlockSpec((1, L_SUB), lambda i, k: (0, 0)),         # bias
                ],
                out_specs=pl.BlockSpec((tile_n, L_SUB), lambda i, k: (i, 0)),
                scratch_shapes=[pltpu.VMEM((tile_n, L_SUB), jnp.float32)],
                compiler_params=pltpu.CompilerParams(
                    dimension_semantics=("parallel", "arbitrary"),
                ),
                cost_estimate=pl.CostEstimate(
                    flops=2 * n_pad * d_pad * L_SUB,
                    transcendentals=0,
                    bytes_accessed=(n_pad * d_pad * isz
                                    + n_tiles * L_SUB * d_pad * isz   # W re-streamed per batch tile
                                    + L_SUB * 4 + n_pad * L_SUB * out_isz),
                ),
            )(x_flat, w, b)

        return out[:N, :L]


if __name__ == "__main__":
    # Small synthetic config: batch=2, channels=4, spatial=16x16, labels=10
    # => D = 4*16*16 = 1024.
    N, C, H, W = 2, 4, 16, 16
    D = C * H * W
    L = 10

    key = jax.random.PRNGKey(0)
    kx, kw, kb = jax.random.split(key, 3)

    x = jax.random.normal(kx, (N, C, H, W), dtype=jnp.float32)

    # Deterministic per-channel normalization stats (CIFAR-like constants).
    mu_c = jnp.array([0.4914, 0.4822, 0.4465, 0.5000], dtype=jnp.float32)
    sigma_c = jnp.array([0.2470, 0.2435, 0.2616, 0.2500], dtype=jnp.float32)

    # nn.Linear default init: U(-1/sqrt(D), 1/sqrt(D)).
    bound = 1.0 / (D ** 0.5)
    weight = jax.random.uniform(kw, (L, D), minval=-bound, maxval=bound, dtype=jnp.float32)
    bias = jax.random.uniform(kb, (L,), minval=-bound, maxval=bound, dtype=jnp.float32)

    # Pure-JAX reference of the ORIGINAL semantics (normalize -> flatten -> linear).
    x_norm = (x - mu_c.reshape(1, C, 1, 1)) / sigma_c.reshape(1, C, 1, 1)
    ref = x_norm.reshape(N, D) @ weight.T + bias

    # 1) precision='float', weight-resident path (the common case).
    head = PallasClassifierHead((C, H, W), mu_c, sigma_c, weight, bias, precision="float")
    logits = jax.block_until_ready(head(x))
    assert logits.shape == (N, L)
    assert jnp.allclose(logits, ref, atol=2e-4, rtol=2e-4), (
        float(jnp.max(jnp.abs(logits - ref))))

    # 2) K-tiled fallback path (forced), still f32.
    head_kt = PallasClassifierHead((C, H, W), mu_c, sigma_c, weight, bias,
                                   precision="float",
                                   max_resident_bytes=0, force_tile_k=256)
    logits_kt = jax.block_until_ready(head_kt(x))
    assert jnp.allclose(logits_kt, ref, atol=2e-4, rtol=2e-4), (
        float(jnp.max(jnp.abs(logits_kt - ref))))

    # 3) precision='half': fold in f32, bf16 operands, f32 MXU accumulation.
    head_h = PallasClassifierHead((C, H, W), mu_c, sigma_c, weight, bias, precision="half")
    logits_h = jax.block_until_ready(head_h(x)).astype(jnp.float32)
    assert logits_h.shape == (N, L)
    assert jnp.allclose(logits_h, ref, atol=0.15, rtol=0.1), (
        float(jnp.max(jnp.abs(logits_h - ref))))

    print("KERNEL_OK")
</pallas_src>

<mosaic_0001>
module attributes {stable_mosaic.version = 11 : i64} {
  func.func @_head_resident_kernel(%arg0: i32, %arg1: memref<8x1024xf32, #tpu.memory_space<vmem>>, %arg2: memref<16x1024xf32, #tpu.memory_space<vmem>>, %arg3: memref<1x16xf32, #tpu.memory_space<vmem>>, %arg4: memref<8x16xf32, #tpu.memory_space<vmem>>) attributes {dimension_semantics = [#tpu.dimension_semantics<parallel>], iteration_bounds = array<i64: 1>, scalar_prefetch = 0 : i64, scratch_operands = 0 : i64, tpu.core_type = #tpu.core_type<tc>, window_params = [{transform_indices = @transform_0, window_bounds = array<i64: 8, 1024>}, {pipeline_mode = #tpu.pipeline_mode<synchronous>, transform_indices = @transform_1, window_bounds = array<i64: 16, 1024>}, {pipeline_mode = #tpu.pipeline_mode<synchronous>, transform_indices = @transform_2, window_bounds = array<i64: 1, 16>}, {transform_indices = @transform_3, window_bounds = array<i64: 8, 16>}]} {
    %c0 = arith.constant 0 : index
    %c0_0 = arith.constant 0 : index
    %0 = vector.load %arg1[%c0, %c0_0] : memref<8x1024xf32, #tpu.memory_space<vmem>>, vector<8x1024xf32>
    %c0_1 = arith.constant 0 : index
    %c0_2 = arith.constant 0 : index
    %1 = vector.load %arg2[%c0_1, %c0_2] : memref<16x1024xf32, #tpu.memory_space<vmem>>, vector<16x1024xf32>
    %cst = arith.constant dense<0.000000e+00> : vector<8x16xf32>
    %2 = tpu.matmul %0, %1, %cst {dimension_numbers = #tpu.dot_dimension_numbers<[1], [1], [0], [0], [0, 0, 1, 0], [], []>} : vector<8x1024xf32>, vector<16x1024xf32>, vector<8x16xf32> -> vector<8x16xf32>
    %c0_3 = arith.constant 0 : index
    %c0_4 = arith.constant 0 : index
    %3 = vector.load %arg3[%c0_3, %c0_4] : memref<1x16xf32, #tpu.memory_space<vmem>>, vector<1x16xf32>
    %4 = vector.broadcast %3 : vector<1x16xf32> to vector<8x16xf32>
    %5 = arith.addf %2, %4 : vector<8x16xf32>
    %c0_5 = arith.constant 0 : index
    %c0_6 = arith.constant 0 : index
    %6 = vector.load %arg4[%c0_5, %c0_6] : memref<8x16xf32, #tpu.memory_space<vmem>>, vector<8x16xf32>
    tpu.vector_store %arg4[%c0_5, %c0_6], %5 {strides = array<i32>} : memref<8x16xf32, #tpu.memory_space<vmem>>, vector<8x16xf32>,
    return
  }
  func.func @transform_0(%arg0: i32) -> (i32, i32) {
    %c0_i32 = arith.constant 0 : i32
    %c0_i32_0 = arith.constant 0 : i32
    return %arg0, %c0_i32 : i32, i32
  }
  func.func @transform_1(%arg0: i32) -> (i32, i32) {
    %c0_i32 = arith.constant 0 : i32
    %c0_i32_0 = arith.constant 0 : i32
    %c0_i32_1 = arith.constant 0 : i32
    return %c0_i32, %c0_i32_0 : i32, i32
  }
  func.func @transform_2(%arg0: i32) -> (i32, i32) {
    %c0_i32 = arith.constant 0 : i32
    %c0_i32_0 = arith.constant 0 : i32
    %c0_i32_1 = arith.constant 0 : i32
    return %c0_i32, %c0_i32_0 : i32, i32
  }
  func.func @transform_3(%arg0: i32) -> (i32, i32) {
    %c0_i32 = arith.constant 0 : i32
    %c0_i32_0 = arith.constant 0 : i32
    return %arg0, %c0_i32 : i32, i32
  }
}

</mosaic_0001>

<bundles_post_ra>
// kernel: _forward_impl.1
= control target key start
LH: loop header
LB: loop body
LE: loop exit
PB: predicated region body
PF: predicated region fallthrough
CT: control target
= control target key end

     0   :  { %vm325_vm0 = vcmask 130048   ;;  %s430_s1 = inlined_call_operand.vmem [shape: f32[16,1024], index: 1, kind: input, shape index: {}]   ;;  %s431_s0 = inlined_call_operand.vmem [shape: f32[8,1024], index: 0, kind: input, shape index: {}]   ;;  %s432_s2 = inlined_call_operand.vmem [shape: f32[1,16], index: 2, kind: input, shape index: {}]   ;;  %s433_s3 = inlined_call_operand.vmem [shape: f32[8,16], index: 3, kind: output, shape index: {}]  }
   0x1   :  { %v31_v0 = vld [vmem:[%s430_s1 + $0x48] sm:$0xff]  ;;  %v33_v1 = vld [vmem:[%s430_s1 + $0x58] sm:$0xff]  ;;  %v30_v2 = vld [vmem:[%s430_s1 + $0x40] sm:$0xff] }
   0x2   :  { %73 = vmatprep.subr.mxu0 %v31_v0  ;;  %143 = vmatprep.subr.mxu1 %v33_v1  ;;  %v32_v3 = vld [vmem:[%s430_s1 + $0x50] sm:$0xff]  ;;  %v23_v4 = vld [vmem:[%s430_s1 + $0x8] sm:$0xff]  ;;  %v25_v5 = vld [vmem:[%s430_s1 + $0x18] sm:$0xff] }
   0x3   :  { %74 = vmatpush1.xpose.msra.mxu0 %v30_v2  ;;  %144 = vmatpush1.xpose.msra.mxu1 %v32_v3  ;;  %v15_v6 = vld [vmem:[%s431_s0 + $0x8] sm:$0xff]  ;;  %v22_v7 = vld [vmem:[%s430_s1] sm:$0xff]  ;;  %v24_v8 = vld [vmem:[%s430_s1 + $0x10] sm:$0xff] }
   0x4   :  { %75 = vmatprep.subr.mxu0 %v23_v4  ;;  %145 = vmatprep.subr.mxu1 %v25_v5  ;;  %v17_v9 = vld [vmem:[%s431_s0 + $0x18] sm:$0xff]  ;;  %v35_v10 = vld [vmem:[%s430_s1 + $0x68] sm:$0xff]  ;;  %v14_v12 = vld [vmem:[%s431_s0] sm:$0xff] }
   0x5   :  { %109 = vmatprep.mubr.f32.mxu0 %v15_v6  ;;  %179 = vmatprep.mubr.f32.mxu1 %v17_v9  ;;  %v37_v11 = vld [vmem:[%s430_s1 + $0x78] sm:$0xff]  ;;  %v16_v13 = vld [vmem:[%s431_s0 + $0x10] sm:$0xff]  ;;  %v34_v14 = vld [vmem:[%s430_s1 + $0x60] sm:$0xff] }
   0x6   :  { %v36_v15 = vld [vmem:[%s430_s1 + $0x70] sm:$0xff]  ;;  %v27_v16 = vld [vmem:[%s430_s1 + $0x28] sm:$0xff]  ;;  %v29_v17 = vld [vmem:[%s430_s1 + $0x38] sm:$0xff] }
   0x7   :  { %76 = vmatpush1.xpose.msra.mxu0 %v22_v7  ;;  %146 = vmatpush1.xpose.msra.mxu1 %v24_v8  ;;  %v19_v18 = vld [vmem:[%s431_s0 + $0x28] sm:$0xff]  ;;  %v21_v19 = vld [vmem:[%s431_s0 + $0x38] sm:$0xff]  ;;  %v26_v20 = vld [vmem:[%s430_s1 + $0x20] sm:$0xff] }
   0x8   :  { %213 = vmatprep.subr.mxu0 %v35_v10  ;;  %283 = vmatprep.subr.mxu1 %v37_v11  ;;  %v28_v21 = vld [vmem:[%s430_s1 + $0x30] sm:$0xff]  ;;  %v18_v22 = vld [vmem:[%s431_s0 + $0x20] sm:$0xff] }
   0x9   :  { %v20_v23 = vld [vmem:[%s431_s0 + $0x30] sm:$0xff]  ;;  %v331_v24 = vld [vmem:[%s432_s2] ss:$0 sm:$0xff] }
   0xa   :  { %110 = vmatmul.mubr.f32.vlgmr.msra.gmra.mxu0 %v14_v12  ;;  %180 = vmatmul.mubr.f32.vlgmr.msra.gmra.mxu1 %v16_v13 }
   0xb   :  { %214 = vmatpush1.xpose.msra.mxu0 %v34_v14  ;;  %284 = vmatpush1.xpose.msra.mxu1 %v36_v15 }
   0xc   :  { %215 = vmatprep.subr.mxu0 %v27_v16  ;;  %285 = vmatprep.subr.mxu1 %v29_v17 }
   0xd   :  { %249 = vmatprep.mubr.f32.mxu0 %v19_v18  ;;  %319 = vmatprep.mubr.f32.mxu1 %v21_v19 }
   0xf   :  { %216 = vmatpush1.xpose.msra.mxu0 %v26_v20  ;;  %286 = vmatpush1.xpose.msra.mxu1 %v28_v21 }
  0x12   :  { %250 = vmatmul.mubr.f32.vlgmr.msra.gmra.mxu0 %v18_v22  ;;  %320 = vmatmul.mubr.f32.vlgmr.msra.gmra.mxu1 %v20_v23 }
  0xca   :  { %v111_v25 = vpop.f32.mrf.mxu0  ;;  %v181_v26 = vpop.f32.mrf.mxu1 }
  0xcb   :  { %v112_v29 = vadd.f32 %v331_v24, %v111_v25 }
  0xcc   :  { %v113_v27 = vpop.f32.mrf.mxu0  ;;  %v183_v28 = vpop.f32.mrf.mxu1 }
  0xcd   :  { %v182_v30 = vadd.f32 %v181_v26, %v112_v29 }
  0xd2   :  { %v251_v31 = vpop.f32.mrf.mxu0  ;;  %v321_v32 = vpop.f32.mrf.mxu1 }
  0xd3   :  { %v252_v33 = vadd.f32 %v251_v31, %v182_v30 }
  0xd4   :  { %v253_v34 = vpop.f32.mrf.mxu0  ;;  %v323_v35 = vpop.f32.mrf.mxu1 }
  0xd5   :  { %v322_v36 = vadd.f32 %v321_v32, %v252_v33 }
  0xd7   :  { %326 = vst.msk [vmem:[%s433_s3] sm:$0xff] %vm325_vm0, %v322_v36 }

</bundles_post_ra>
